<compile_context>
chip_gen: v5e
topology: v5e:2x2
jax: 0.10.0
libtpu: 0.0.40
codegen_flags: <defaults>
</compile_context>

<pallas_src>
import jax
import jax.numpy as jnp
import numpy as np
from jax import lax
from jax.experimental import pallas as pl
from jax.experimental.pallas import tpu as pltpu

_PAD = 128  # flat-axis halo (>= W+1); 128 keeps halo/middle stores lane-aligned


# ----------------------------------------------------------------------------
# Fused Pallas kernel: conv1 -> bn1 -> relu -> conv2 -> bn2 -> +x -> relu
# ----------------------------------------------------------------------------
def _make_fused_block_kernel(H, W):
    HW = H * W

    def kernel(x_ref, w1_ref, w2_ref, sb_ref, mask_ref, o_ref, xp_ref):
        # x_ref   : (C, HW)          one image, channels on sublanes, pixels on lanes
        # w*_ref  : (Cout, 9*C)      bf16 im2col weights (tap-major, channel-minor)
        # sb_ref  : (Cout, 4)        f32 folded BN params, columns = [s1, b1, s2, b2]
        # mask_ref: (2, HW)          f32 row-wrap masks, rows = [not_left, not_right]
        # o_ref   : (Cout, HW)
        # xp_ref  : (C, HW+2*_PAD)   f32 zero-halo flat scratch shared by both convs
        C = x_ref.shape[0]

        # Zero only the two halo slabs (2 aligned vreg stores).  Unconditional:
        # with a "parallel" grid the batch steps may be split across cores, so
        # a program_id(0)==0 guard would leave the second core's scratch dirty.
        zeros_halo = jnp.zeros((C, _PAD), jnp.float32)
        xp_ref[:, 0:_PAD] = zeros_halo
        xp_ref[:, _PAD + HW:_PAD + HW + _PAD] = zeros_halo

        not_left = mask_ref[0:1, :]      # (1, HW): 0.0 where w == 0
        not_right = mask_ref[1:2, :]     # (1, HW): 0.0 where w == W-1

        def conv3x3(inp, w_bf16):
            """inp: (C, HW) f32, w_bf16: (Cout, 9*C) bf16 -> (Cout, HW) f32."""
            xp_ref[:, _PAD:_PAD + HW] = inp              # lane-aligned middle store
            taps = []
            for dh in (-1, 0, 1):
                for dw in (-1, 0, 1):
                    start = _PAD + dh * W + dw
                    t = xp_ref[:, start:start + HW]      # shifted (C, HW) view
                    if dw == -1:                         # kill row-wrap reads
                        t = t * not_left
                    elif dw == 1:
                        t = t * not_right
                    taps.append(t)
            # (9*C, HW) im2col operand; single bf16 MXU matmul, f32 accumulate.
            im2col = jnp.concatenate(taps, axis=0).astype(jnp.bfloat16)
            return jnp.dot(w_bf16, im2col, preferred_element_type=jnp.float32)

        x = x_ref[...].astype(jnp.float32)               # also the shortcut
        s1 = sb_ref[:, 0:1]
        b1 = sb_ref[:, 1:2]
        s2 = sb_ref[:, 2:3]
        b2 = sb_ref[:, 3:4]

        # conv1 -> bn1 -> act1   (intermediate never leaves VMEM / vregs)
        y = conv3x3(x, w1_ref[...])
        y = jnp.maximum(y * s1 + b1, 0.0)

        # conv2 -> bn2 -> += shortcut -> act2
        z = conv3x3(y, w2_ref[...])
        z = z * s2 + b2
        o_ref[...] = jnp.maximum(z + x, 0.0).astype(o_ref.dtype)

    return kernel


# ----------------------------------------------------------------------------
# Wrapper
# ----------------------------------------------------------------------------
def dynamic_basic_block(x_nchw, context, params):
    """Forward of DynamicBasicBlock. Returns (out_nchw, context)."""
    N, C, H, W = x_nchw.shape
    HW = H * W
    Cout = params["w1"].shape[0]
    assert params["w1"].shape == (Cout, 9 * C)
    assert Cout == C, "identity shortcut requires inplanes == planes (downsample=None)"

    x_flat = x_nchw.reshape(N, C, HW)                    # free reshape, no HBM pass

    # Row-wrap masks for the dw = -1 / +1 taps, built once outside the kernel.
    col = jnp.arange(HW, dtype=jnp.int32) % W
    colmask = jnp.stack([(col != 0).astype(jnp.float32),
                         (col != W - 1).astype(jnp.float32)], axis=0)  # (2, HW)

    out_flat = pl.pallas_call(
        _make_fused_block_kernel(H, W),
        out_shape=jax.ShapeDtypeStruct((N, Cout, HW), x_nchw.dtype),
        grid=(N,),
        in_specs=[
            pl.BlockSpec((None, C, HW), lambda n: (n, 0, 0)),       # x (one image)
            pl.BlockSpec((Cout, 9 * C), lambda n: (0, 0)),          # w1 (bf16)
            pl.BlockSpec((Cout, 9 * Cout), lambda n: (0, 0)),       # w2 (bf16)
            pl.BlockSpec((Cout, 4), lambda n: (0, 0)),              # packed BN s/b
            pl.BlockSpec((2, HW), lambda n: (0, 0)),                # row-wrap masks
        ],
        out_specs=pl.BlockSpec((None, Cout, HW), lambda n: (n, 0, 0)),
        scratch_shapes=[pltpu.VMEM((C, HW + 2 * _PAD), jnp.float32)],
        compiler_params=pltpu.CompilerParams(
            dimension_semantics=("parallel",)),
    )(x_flat, params["w1"], params["w2"], params["sb"], colmask)

    return out_flat.reshape(N, Cout, H, W), context      # free reshape back to NCHW


# ----------------------------------------------------------------------------
# Deterministic parameter construction (BasicBlock shapes, eval-mode BN fold)
# ----------------------------------------------------------------------------
def make_params(key, inplanes, planes, eps=1e-5):
    ks = jax.random.split(key, 10)
    # PyTorch conv weight layout (Cout, Cin, 3, 3), bias=False
    w1_oihw = jax.random.normal(ks[0], (planes, inplanes, 3, 3), jnp.float32)
    w1_oihw = w1_oihw * (1.0 / np.sqrt(9 * inplanes))
    w2_oihw = jax.random.normal(ks[1], (planes, planes, 3, 3), jnp.float32)
    w2_oihw = w2_oihw * (1.0 / np.sqrt(9 * planes))
    gamma1 = 1.0 + 0.1 * jax.random.normal(ks[2], (planes,), jnp.float32)
    beta1 = 0.1 * jax.random.normal(ks[3], (planes,), jnp.float32)
    gamma2 = 1.0 + 0.1 * jax.random.normal(ks[4], (planes,), jnp.float32)
    beta2 = 0.1 * jax.random.normal(ks[5], (planes,), jnp.float32)
    mean1 = 0.1 * jax.random.normal(ks[6], (planes,), jnp.float32)
    var1 = 1.0 + 0.2 * jax.random.uniform(ks[7], (planes,), jnp.float32)
    mean2 = 0.1 * jax.random.normal(ks[8], (planes,), jnp.float32)
    var2 = 1.0 + 0.2 * jax.random.uniform(ks[9], (planes,), jnp.float32)

    # full eval-mode BN fold (running mean/var included, not assumed 0/1)
    s1 = gamma1 / jnp.sqrt(var1 + eps)
    b1 = beta1 - mean1 * s1
    s2 = gamma2 / jnp.sqrt(var2 + eps)
    b2 = beta2 - mean2 * s2

    def to_im2col_layout(w_oihw):        # (Cout,Cin,3,3) -> (Cout, 9*Cin) bf16
        cout, cin = w_oihw.shape[0], w_oihw.shape[1]
        w = jnp.transpose(w_oihw, (0, 2, 3, 1)).reshape(cout, 9 * cin)
        return w.astype(jnp.bfloat16)    # bf16 MXU operand, f32 accumulation

    return {
        # kernel-layout params (bf16 weights; BN scale/bias packed, f32)
        "w1": to_im2col_layout(w1_oihw), "w2": to_im2col_layout(w2_oihw),
        "sb": jnp.stack([s1, b1, s2, b2], axis=1),       # (planes, 4) f32
        # raw tensors for the pure-JAX reference
        "w1_oihw": w1_oihw, "w2_oihw": w2_oihw,
        "gamma1": gamma1, "beta1": beta1, "mean1": mean1, "var1": var1,
        "gamma2": gamma2, "beta2": beta2, "mean2": mean2, "var2": var2,
        "eps": eps,
    }


def _reference(x_nchw, params):
    """Pure-JAX NCHW reference of the same forward (for correctness check)."""
    def conv(x, w_oihw):
        return lax.conv_general_dilated(
            x, w_oihw, (1, 1), "SAME",
            dimension_numbers=("NCHW", "OIHW", "NCHW"),
            precision=lax.Precision.HIGHEST)

    def bn(x, g, b, m, v, eps):
        g = g.reshape(1, -1, 1, 1); b = b.reshape(1, -1, 1, 1)
        m = m.reshape(1, -1, 1, 1); v = v.reshape(1, -1, 1, 1)
        return (x - m) / jnp.sqrt(v + eps) * g + b

    eps = params["eps"]
    y = conv(x_nchw, params["w1_oihw"])
    y = jnp.maximum(bn(y, params["gamma1"], params["beta1"],
                       params["mean1"], params["var1"], eps), 0.0)
    y = conv(y, params["w2_oihw"])
    y = bn(y, params["gamma2"], params["beta2"],
           params["mean2"], params["var2"], eps)
    return jnp.maximum(y + x_nchw, 0.0)


if __name__ == "__main__":
    N, C, H, W = 2, 8, 16, 16        # inplanes == planes == 8, stride=1
    class_emb_dim = 16
    key = jax.random.PRNGKey(0)
    kx, kc, kp = jax.random.split(key, 3)
    x = jax.random.normal(kx, (N, C, H, W), jnp.float32)
    context = jax.random.normal(kc, (N, class_emb_dim), jnp.float32)
    params = make_params(kp, C, C)

    out_nchw, ctx_out = dynamic_basic_block(x, context, params)
    out_nchw = jax.block_until_ready(out_nchw)

    ref_nchw = _reference(x, params)
    assert out_nchw.shape == (N, C, H, W)
    assert ctx_out.shape == (N, class_emb_dim)
    # bf16 MXU operands (f32 accumulate) vs Precision.HIGHEST f32 reference:
    # expected ~1e-2-level error, so tolerance is loosened versus the f32 run.
    assert np.allclose(np.asarray(out_nchw), np.asarray(ref_nchw),
                       atol=5e-2, rtol=5e-2)
    print("KERNEL_OK")
</pallas_src>

<mosaic_0001>
module attributes {stable_mosaic.version = 11 : i64} {
  func.func @kernel(%arg0: i32, %arg1: memref<1x8x256xf32, #tpu.memory_space<vmem>>, %arg2: memref<8x72xbf16, #tpu.memory_space<vmem>>, %arg3: memref<8x72xbf16, #tpu.memory_space<vmem>>, %arg4: memref<8x4xf32, #tpu.memory_space<vmem>>, %arg5: memref<2x256xf32, #tpu.memory_space<vmem>>, %arg6: memref<1x8x256xf32, #tpu.memory_space<vmem>>, %arg7: memref<8x512xf32, #tpu.memory_space<vmem>>) attributes {dimension_semantics = [#tpu.dimension_semantics<parallel>], iteration_bounds = array<i64: 2>, scalar_prefetch = 0 : i64, scratch_operands = 1 : i64, tpu.core_type = #tpu.core_type<tc>, window_params = [{transform_indices = @transform_0, window_bounds = array<i64: 1, 8, 256>}, {pipeline_mode = #tpu.pipeline_mode<synchronous>, transform_indices = @transform_1, window_bounds = array<i64: 8, 72>}, {pipeline_mode = #tpu.pipeline_mode<synchronous>, transform_indices = @transform_2, window_bounds = array<i64: 8, 72>}, {pipeline_mode = #tpu.pipeline_mode<synchronous>, transform_indices = @transform_3, window_bounds = array<i64: 8, 4>}, {pipeline_mode = #tpu.pipeline_mode<synchronous>, transform_indices = @transform_4, window_bounds = array<i64: 2, 256>}, {transform_indices = @transform_5, window_bounds = array<i64: 1, 8, 256>}]} {
    %cst = arith.constant 0.000000e+00 : f32
    %0 = vector.broadcast %cst : f32 to vector<8x128xf32>
    %c0 = arith.constant 0 : index
    %c0_0 = arith.constant 0 : index
    %1 = vector.load %arg7[%c0, %c0_0] : memref<8x512xf32, #tpu.memory_space<vmem>>, vector<8x128xf32>
    tpu.vector_store %arg7[%c0, %c0_0], %0 {strides = array<i32>} : memref<8x512xf32, #tpu.memory_space<vmem>>, vector<8x128xf32>,
    %c0_1 = arith.constant 0 : index
    %c384 = arith.constant 384 : index
    %2 = vector.load %arg7[%c0_1, %c384] : memref<8x512xf32, #tpu.memory_space<vmem>>, vector<8x128xf32>
    tpu.vector_store %arg7[%c0_1, %c384], %0 {strides = array<i32>} : memref<8x512xf32, #tpu.memory_space<vmem>>, vector<8x128xf32>,
    %c0_2 = arith.constant 0 : index
    %c0_3 = arith.constant 0 : index
    %3 = vector.load %arg5[%c0_2, %c0_3] : memref<2x256xf32, #tpu.memory_space<vmem>>, vector<1x256xf32>
    %c1 = arith.constant 1 : index
    %c0_4 = arith.constant 0 : index
    %4 = vector.load %arg5[%c1, %c0_4] : memref<2x256xf32, #tpu.memory_space<vmem>>, vector<1x256xf32>
    %c0_5 = arith.constant 0 : index
    %c0_6 = arith.constant 0 : index
    %c0_7 = arith.constant 0 : index
    %5 = vector.load %arg1[%c0_5, %c0_6, %c0_7] : memref<1x8x256xf32, #tpu.memory_space<vmem>>, vector<1x8x256xf32>
    %6 = vector.shape_cast %5 : vector<1x8x256xf32> to vector<8x256xf32>
    %c0_8 = arith.constant 0 : index
    %c0_9 = arith.constant 0 : index
    %7 = vector.load %arg4[%c0_8, %c0_9] : memref<8x4xf32, #tpu.memory_space<vmem>>, vector<8x1xf32>
    %c0_10 = arith.constant 0 : index
    %c1_11 = arith.constant 1 : index
    %8 = vector.load %arg4[%c0_10, %c1_11] : memref<8x4xf32, #tpu.memory_space<vmem>>, vector<8x1xf32>
    %c0_12 = arith.constant 0 : index
    %c2 = arith.constant 2 : index
    %9 = vector.load %arg4[%c0_12, %c2] : memref<8x4xf32, #tpu.memory_space<vmem>>, vector<8x1xf32>
    %c0_13 = arith.constant 0 : index
    %c3 = arith.constant 3 : index
    %10 = vector.load %arg4[%c0_13, %c3] : memref<8x4xf32, #tpu.memory_space<vmem>>, vector<8x1xf32>
    %c0_14 = arith.constant 0 : index
    %c0_15 = arith.constant 0 : index
    %11 = vector.load %arg2[%c0_14, %c0_15] : memref<8x72xbf16, #tpu.memory_space<vmem>>, vector<8x72xbf16>
    %c0_16 = arith.constant 0 : index
    %c128 = arith.constant 128 : index
    %12 = vector.load %arg7[%c0_16, %c128] : memref<8x512xf32, #tpu.memory_space<vmem>>, vector<8x256xf32>
    tpu.vector_store %arg7[%c0_16, %c128], %6 {strides = array<i32>} : memref<8x512xf32, #tpu.memory_space<vmem>>, vector<8x256xf32>,
    %c0_17 = arith.constant 0 : index
    %c111 = arith.constant 111 : index
    %13 = vector.load %arg7[%c0_17, %c111] : memref<8x512xf32, #tpu.memory_space<vmem>>, vector<8x256xf32>
    %14 = vector.broadcast %3 : vector<1x256xf32> to vector<8x256xf32>
    %15 = arith.mulf %13, %14 : vector<8x256xf32>
    %c0_18 = arith.constant 0 : index
    %c112 = arith.constant 112 : index
    %16 = vector.load %arg7[%c0_18, %c112] : memref<8x512xf32, #tpu.memory_space<vmem>>, vector<8x256xf32>
    %c0_19 = arith.constant 0 : index
    %c113 = arith.constant 113 : index
    %17 = vector.load %arg7[%c0_19, %c113] : memref<8x512xf32, #tpu.memory_space<vmem>>, vector<8x256xf32>
    %18 = vector.broadcast %4 : vector<1x256xf32> to vector<8x256xf32>
    %19 = arith.mulf %17, %18 : vector<8x256xf32>
    %c0_20 = arith.constant 0 : index
    %c127 = arith.constant 127 : index
    %20 = vector.load %arg7[%c0_20, %c127] : memref<8x512xf32, #tpu.memory_space<vmem>>, vector<8x256xf32>
    %21 = vector.broadcast %3 : vector<1x256xf32> to vector<8x256xf32>
    %22 = arith.mulf %20, %21 : vector<8x256xf32>
    %c0_21 = arith.constant 0 : index
    %c128_22 = arith.constant 128 : index
    %23 = vector.load %arg7[%c0_21, %c128_22] : memref<8x512xf32, #tpu.memory_space<vmem>>, vector<8x256xf32>
    %c0_23 = arith.constant 0 : index
    %c129 = arith.constant 129 : index
    %24 = vector.load %arg7[%c0_23, %c129] : memref<8x512xf32, #tpu.memory_space<vmem>>, vector<8x256xf32>
    %25 = vector.broadcast %4 : vector<1x256xf32> to vector<8x256xf32>
    %26 = arith.mulf %24, %25 : vector<8x256xf32>
    %c0_24 = arith.constant 0 : index
    %c143 = arith.constant 143 : index
    %27 = vector.load %arg7[%c0_24, %c143] : memref<8x512xf32, #tpu.memory_space<vmem>>, vector<8x256xf32>
    %28 = vector.broadcast %3 : vector<1x256xf32> to vector<8x256xf32>
    %29 = arith.mulf %27, %28 : vector<8x256xf32>
    %c0_25 = arith.constant 0 : index
    %c144 = arith.constant 144 : index
    %30 = vector.load %arg7[%c0_25, %c144] : memref<8x512xf32, #tpu.memory_space<vmem>>, vector<8x256xf32>
    %c0_26 = arith.constant 0 : index
    %c145 = arith.constant 145 : index
    %31 = vector.load %arg7[%c0_26, %c145] : memref<8x512xf32, #tpu.memory_space<vmem>>, vector<8x256xf32>
    %32 = vector.broadcast %4 : vector<1x256xf32> to vector<8x256xf32>
    %33 = arith.mulf %31, %32 : vector<8x256xf32>
    %34 = tpu.concatenate %15, %16, %19, %22, %23, %26, %29, %30, %33 in 0 : vector<8x256xf32>, vector<8x256xf32>, vector<8x256xf32>, vector<8x256xf32>, vector<8x256xf32>, vector<8x256xf32>, vector<8x256xf32>, vector<8x256xf32>, vector<8x256xf32> -> vector<72x256xf32>
    %35 = arith.truncf %34 : vector<72x256xf32> to vector<72x256xbf16>
    %cst_27 = arith.constant dense<0.000000e+00> : vector<8x256xf32>
    %36 = tpu.matmul %11, %35, %cst_27 {dimension_numbers = #tpu.dot_dimension_numbers<[1], [0], [0], [1], [0, 0, 1, 1], [], []>} : vector<8x72xbf16>, vector<72x256xbf16>, vector<8x256xf32> -> vector<8x256xf32>
    %37 = vector.broadcast %7 : vector<8x1xf32> to vector<8x256xf32>
    %38 = arith.mulf %36, %37 : vector<8x256xf32>
    %39 = vector.broadcast %8 : vector<8x1xf32> to vector<8x256xf32>
    %40 = arith.addf %38, %39 : vector<8x256xf32>
    %cst_28 = arith.constant 0.000000e+00 : f32
    %41 = vector.broadcast %cst_28 : f32 to vector<8x256xf32>
    %42 = arith.maximumf %40, %41 : vector<8x256xf32>
    %c0_29 = arith.constant 0 : index
    %c0_30 = arith.constant 0 : index
    %43 = vector.load %arg3[%c0_29, %c0_30] : memref<8x72xbf16, #tpu.memory_space<vmem>>, vector<8x72xbf16>
    %c0_31 = arith.constant 0 : index
    %c128_32 = arith.constant 128 : index
    %44 = vector.load %arg7[%c0_31, %c128_32] : memref<8x512xf32, #tpu.memory_space<vmem>>, vector<8x256xf32>
    tpu.vector_store %arg7[%c0_31, %c128_32], %42 {strides = array<i32>} : memref<8x512xf32, #tpu.memory_space<vmem>>, vector<8x256xf32>,
    %c0_33 = arith.constant 0 : index
    %c111_34 = arith.constant 111 : index
    %45 = vector.load %arg7[%c0_33, %c111_34] : memref<8x512xf32, #tpu.memory_space<vmem>>, vector<8x256xf32>
    %46 = vector.broadcast %3 : vector<1x256xf32> to vector<8x256xf32>
    %47 = arith.mulf %45, %46 : vector<8x256xf32>
    %c0_35 = arith.constant 0 : index
    %c112_36 = arith.constant 112 : index
    %48 = vector.load %arg7[%c0_35, %c112_36] : memref<8x512xf32, #tpu.memory_space<vmem>>, vector<8x256xf32>
    %c0_37 = arith.constant 0 : index
    %c113_38 = arith.constant 113 : index
    %49 = vector.load %arg7[%c0_37, %c113_38] : memref<8x512xf32, #tpu.memory_space<vmem>>, vector<8x256xf32>
    %50 = vector.broadcast %4 : vector<1x256xf32> to vector<8x256xf32>
    %51 = arith.mulf %49, %50 : vector<8x256xf32>
    %c0_39 = arith.constant 0 : index
    %c127_40 = arith.constant 127 : index
    %52 = vector.load %arg7[%c0_39, %c127_40] : memref<8x512xf32, #tpu.memory_space<vmem>>, vector<8x256xf32>
    %53 = vector.broadcast %3 : vector<1x256xf32> to vector<8x256xf32>
    %54 = arith.mulf %52, %53 : vector<8x256xf32>
    %c0_41 = arith.constant 0 : index
    %c128_42 = arith.constant 128 : index
    %55 = vector.load %arg7[%c0_41, %c128_42] : memref<8x512xf32, #tpu.memory_space<vmem>>, vector<8x256xf32>
    %c0_43 = arith.constant 0 : index
    %c129_44 = arith.constant 129 : index
    %56 = vector.load %arg7[%c0_43, %c129_44] : memref<8x512xf32, #tpu.memory_space<vmem>>, vector<8x256xf32>
    %57 = vector.broadcast %4 : vector<1x256xf32> to vector<8x256xf32>
    %58 = arith.mulf %56, %57 : vector<8x256xf32>
    %c0_45 = arith.constant 0 : index
    %c143_46 = arith.constant 143 : index
    %59 = vector.load %arg7[%c0_45, %c143_46] : memref<8x512xf32, #tpu.memory_space<vmem>>, vector<8x256xf32>
    %60 = vector.broadcast %3 : vector<1x256xf32> to vector<8x256xf32>
    %61 = arith.mulf %59, %60 : vector<8x256xf32>
    %c0_47 = arith.constant 0 : index
    %c144_48 = arith.constant 144 : index
    %62 = vector.load %arg7[%c0_47, %c144_48] : memref<8x512xf32, #tpu.memory_space<vmem>>, vector<8x256xf32>
    %c0_49 = arith.constant 0 : index
    %c145_50 = arith.constant 145 : index
    %63 = vector.load %arg7[%c0_49, %c145_50] : memref<8x512xf32, #tpu.memory_space<vmem>>, vector<8x256xf32>
    %64 = vector.broadcast %4 : vector<1x256xf32> to vector<8x256xf32>
    %65 = arith.mulf %63, %64 : vector<8x256xf32>
    %66 = tpu.concatenate %47, %48, %51, %54, %55, %58, %61, %62, %65 in 0 : vector<8x256xf32>, vector<8x256xf32>, vector<8x256xf32>, vector<8x256xf32>, vector<8x256xf32>, vector<8x256xf32>, vector<8x256xf32>, vector<8x256xf32>, vector<8x256xf32> -> vector<72x256xf32>
    %67 = arith.truncf %66 : vector<72x256xf32> to vector<72x256xbf16>
    %cst_51 = arith.constant dense<0.000000e+00> : vector<8x256xf32>
    %68 = tpu.matmul %43, %67, %cst_51 {dimension_numbers = #tpu.dot_dimension_numbers<[1], [0], [0], [1], [0, 0, 1, 1], [], []>} : vector<8x72xbf16>, vector<72x256xbf16>, vector<8x256xf32> -> vector<8x256xf32>
    %69 = vector.broadcast %9 : vector<8x1xf32> to vector<8x256xf32>
    %70 = arith.mulf %68, %69 : vector<8x256xf32>
    %71 = vector.broadcast %10 : vector<8x1xf32> to vector<8x256xf32>
    %72 = arith.addf %70, %71 : vector<8x256xf32>
    %73 = arith.addf %72, %6 : vector<8x256xf32>
    %cst_52 = arith.constant 0.000000e+00 : f32
    %74 = vector.broadcast %cst_52 : f32 to vector<8x256xf32>
    %75 = arith.maximumf %73, %74 : vector<8x256xf32>
    %c0_53 = arith.constant 0 : index
    %c0_54 = arith.constant 0 : index
    %c0_55 = arith.constant 0 : index
    %76 = vector.load %arg6[%c0_53, %c0_54, %c0_55] : memref<1x8x256xf32, #tpu.memory_space<vmem>>, vector<1x8x256xf32>
    %77 = vector.shape_cast %76 : vector<1x8x256xf32> to vector<8x256xf32>
    %78 = vector.shape_cast %75 : vector<8x256xf32> to vector<1x8x256xf32>
    tpu.vector_store %arg6[%c0_53, %c0_54, %c0_55], %78 {strides = array<i32>} : memref<1x8x256xf32, #tpu.memory_space<vmem>>, vector<1x8x256xf32>,
    return
  }
  func.func @transform_0(%arg0: i32) -> (i32, i32, i32) {
    %c0_i32 = arith.constant 0 : i32
    %c0_i32_0 = arith.constant 0 : i32
    %c0_i32_1 = arith.constant 0 : i32
    return %arg0, %c0_i32, %c0_i32_0 : i32, i32, i32
  }
  func.func @transform_1(%arg0: i32) -> (i32, i32) {
    %c0_i32 = arith.constant 0 : i32
    %c0_i32_0 = arith.constant 0 : i32
    %c0_i32_1 = arith.constant 0 : i32
    return %c0_i32, %c0_i32_0 : i32, i32
  }
  func.func @transform_2(%arg0: i32) -> (i32, i32) {
    %c0_i32 = arith.constant 0 : i32
    %c0_i32_0 = arith.constant 0 : i32
    %c0_i32_1 = arith.constant 0 : i32
    return %c0_i32, %c0_i32_0 : i32, i32
  }
  func.func @transform_3(%arg0: i32) -> (i32, i32) {
    %c0_i32 = arith.constant 0 : i32
    %c0_i32_0 = arith.constant 0 : i32
    %c0_i32_1 = arith.constant 0 : i32
    return %c0_i32, %c0_i32_0 : i32, i32
  }
  func.func @transform_4(%arg0: i32) -> (i32, i32) {
    %c0_i32 = arith.constant 0 : i32
    %c0_i32_0 = arith.constant 0 : i32
    %c0_i32_1 = arith.constant 0 : i32
    return %c0_i32, %c0_i32_0 : i32, i32
  }
  func.func @transform_5(%arg0: i32) -> (i32, i32, i32) {
    %c0_i32 = arith.constant 0 : i32
    %c0_i32_0 = arith.constant 0 : i32
    %c0_i32_1 = arith.constant 0 : i32
    return %arg0, %c0_i32, %c0_i32_0 : i32, i32, i32
  }
}

</mosaic_0001>

<bundles_post_ra>
// kernel: tpu_custom_call.1
= control target key start
LH: loop header
LB: loop body
LE: loop exit
PB: predicated region body
PF: predicated region fallthrough
CT: control target
= control target key end

     0   :  { %10 = vsyncpa [#allocation4], 0  ;;  %s1685_s0 = inlined_call_operand.hbm [shape: f32[2,8,256], index: 0, kind: input, shape index: {}]   ;;  %s1686_s1 = inlined_call_operand.vmem [shape: bf16[8,72], index: 1, kind: input, shape index: {}]   ;;  %s1687_s2 = inlined_call_operand.vmem [shape: bf16[8,72], index: 2, kind: input, shape index: {}]   ;;  %s1688_s3 = inlined_call_operand.vmem [shape: f32[8,4], index: 3, kind: input, shape index: {}]   ;;  %s1689_s4 = inlined_call_operand.vmem [shape: f32[2,256], index: 4, kind: input, shape index: {}]   ;;  %s1690_s5 = inlined_call_operand.hbm [shape: f32[2,8,256], index: 5, kind: output, shape index: {}]  }
   0x1   :  { %12 = vsyncpa [#allocation4 + $0x1], 0 }
   0x2   :  { %13 = vsyncpa [#allocation5], 0 }
   0x3   :  { %15 = vsyncpa [#allocation5 + $0x1], 0  ;;  %s1247_s18 = smov 0   ;;  %s1249_s19 = smov 0  }
   0x4   :  { %s1251_s20 = smov 0   ;;  %s1253_s21 = smov 0  }
   0x5 LB: > { %s1268_s22 = sadd.s32 4294967295, %s1198_s21   ;;  %s933_s23 = sadd.s32 4294967294, %s1198_s21   ;;  %s1198_s21 = sphi %s1253_s21, %s1700_s21   ;;  %s1194_s20 = sphi %s1251_s20, %s1699_s20   ;;  %s1190_s19 = sphi %s1249_s19, %s1698_s19   ;;  %s1186_s18 = sphi %s1247_s18, %s1697_s18  }
   0x6   : > { %s1272_s24 = sadd.s32 1, %s1198_s21   ;;  %s28_s25 = sadd.s32 1, %s1194_s20 }
   0x7   : > { %s25_s26 = ssub.s32 %s1198_s21, %s1272_s24  ;;  %p35_p0 = scmp.ne.s32.totalorder %s1194_s20, %s1190_s19 }
   0x8   : > { %p26_p1 = scmp.eq.s32.totalorder %s25_s26, 0  ;;  %p36_p2 = scmp.eq.s32.totalorder %s1198_s21, 0 }
   0x9   : > { %p41_p3 = scmp.ne.s32.totalorder %s1190_s19, %s1186_s18  ;;  %p42_p4 = scmp.eq.s32.totalorder %s1268_s22, 0 }
   0xa   : > { %s1284_s27 = scalar_select %p26_p1, %s1194_s20, %s28_s25  }
   0xb   : > { %p1286_p5 = por %p36_p2, %p35_p0  ;;  %p1290_p6 = por %p42_p4, %p41_p3 }
   0xc   : > { %p149_p7 = scmp.eq.s32.totalorder %s1268_s22, 1  ;;  %p155_p8 = scmp.eq.s32.totalorder %s933_s23, 1 }
   0xd   : > { %p966_p10 = scmp.lt.s32.totalorder %s1198_s21, 2  ;;  %s187_s7 = sand.u32 1, %s1194_s20  }
   0xe   : > { %p1297_p11 = por %p149_p7, %p35_p0  ;;  %p1301_p12 = por %p155_p8, %p41_p3 }
   0xf   : > { %s952_s8 = sshll.u32 %s1198_s21, 4  ;;  %s936_s9 = sshll.u32 %s187_s7, 4 }
  0x10   : > { %s196_s12 = scalar_lea.hbm %s1685_s0, %s952_s8  ;;  %s191_s14 = scalar_lea.vmem [#allocation3], %s936_s9 }
  0x11   : > { %s198_s13 = sshll.u32 %s196_s12, 4  ;;  %s200_s15 = sshll.u32 %s191_s14, 4  ;;  %s199_s13 = int_to_ptr.hbm [resolvable:$true] %s198_s13  ;;  %s201_s15 = int_to_ptr.vmem [resolvable:$true] %s200_s15 }
  0x12   : > { %p1312_p13 = pnand %p966_p10, %p1286_p5  ;;  %p939_p0 = scmp.ge.s32.totalorder %s1198_s21, 1 }
  0x13   : > { %p205_p1 = scmp.lt.s32.totalorder %s1198_s21, 3  ;;  %s188_s17 = scalar_lea.sflag [#allocation4], %s187_s7 }
  0x14   : > { %s1102_s23 = sshra.s32 %s199_s13, 4  ;;  %p1106_p3 = pneg %p1312_p13  ;;  %s1103_s23 = int_to_ptr.hbm [resolvable:$true] %s1102_s23 }
  0x15   : > { %s1104_s25 = scalar_lea.hbm %s1103_s23, 16  ;;  %s1109_s28 = scalar_lea.hbm %s1685_s0, 32 }
  0x16   : > { %p1105_p2 = scmp.ne.s32.totalorder %s1103_s23, %s1104_s25  ;;  %p1110_p5 = scmp.lt.s32.totalorder %s1103_s23, %s1685_s0 }
  0x17   : > { %p1111_p8 = scmp.lt.s32.totalorder %s1109_s28, %s1104_s25 }
  0x18   : > { %p1107_p4 = pnand %p1106_p3, %p1105_p2 }
  0x19   : > { %p1112_p10 = por %p1111_p8, %p1110_p5 }
  0x1a   : > { %p1108_p7 = pneg %p1107_p4 }
  0x1c   : > { %p1113_p9 = pnand %p1112_p10, %p1108_p7 }
  0x1e   : > { %1116 = shalt.err (!%p1113_p9)
}
  0x1f   : > { %961 = dma.hbm_to_vmem [thread:$0]  (!%p1312_p13), %s199_s13, 256, %s201_s15, %s188_s17  }
  0x20   : > { %p206_p2 = pnand %p939_p0, %p205_p1 }
  0x21   : > { %s1333_s7 = sand.u32 (!%p206_p2), 1, %s1190_s19  }
  0x22   : > { %209 = sbr.rel (%p206_p2) target bundleno = 989 (0x3dd), region = 40  ;;  %s940_s11 = sshll.u32 (!%p206_p2), %s1333_s7, 4 }
  0x23   : > { %s212_s12 = scalar_lea.sflag (!%p206_p2), [#allocation4], %s1333_s7  ;;  %s215_s14 = scalar_lea.vmem (!%p206_p2), [#allocation3], %s940_s11 }
  0x27   : > { %1177 = dma.done.wait (%p1290_p6), %s212_s12, 256  }
  0x28   : > { %1179 = vsyncadd (%p1290_p6), %s212_s12, 4294967040  ;;  %v942_v0 = vld [vmem:[%s1689_s4 + $0x1] ss:$2 sm:$0x3]  ;;  %s1200_s23 = smov 17   ;;  %s1201_s25 = smov 15  }
  0x29   : > { %v246_v1 = vld [vmem:[%s1689_s4] ss:$2 sm:$0x3]  ;;  %v274_v2 = vperm.slane %v942_v0, 0  ;;  %s1202_s26 = smov 1   ;;  %v275_v4 = vperm.slane %v942_v0, 1 }
  0x2a   : > { %v1349_v3 = vperm.slane %v246_v1, 0  ;;  %v1353_v5 = vperm.slane %v246_v1, 1  ;;  %s1203_s29 = smov 113   ;;  %s1204_s8 = smov 127   ;;  %v1205_v6 = vmov 0.0   ;;  %v1363_v7 = vld [vmem:[%s215_s14] sm:$0xff] }
  0x2b   : > { %327 = vrot.lane.b32.xlu0 %v274_v2, %s1200_s23  ;;  %303 = vrot.lane.b32.xlu2 %v274_v2, %s1202_s26  ;;  %s1206_s28 = smov 95   ;;  %v1365_v8 = vld [vmem:[%s215_s14 + $0x8] sm:$0xff]  ;;  %s1207_s9 = smov 111   ;;  %vm319_vm0 = vcmask 121856   ;;  %vm331_vm1 = vcmask 138240   ;;  %vm292_vm2 = vcmask 1039360   ;;  %v1052_v45 = vpack.i.bf16 %v1363_v7, %v1205_v6 }
  0x2c   : > { %315 = vrot.lane.b32.xlu1 %v1349_v3, %s1201_s25  ;;  %v1017_v9 = vpack.i.bf16 %v1365_v8, %v1363_v7  ;;  %s1208_s10 = smov 110   ;;  %s1209_s12 = smov 94   ;;  %vm307_vm3 = vcmask 7168   ;;  %vm280_vm4 = vcmask 924672   ;;  %vm445_vm5 = vcmask 769024  }
  0x2d   : > { %s1210_s14 = smov 96   ;;  %s1211_s13 = smov 126   ;;  %vm415_vm6 = vcmask 785408   ;;  %vm430_vm7 = vcmask 777216   ;;  %vm400_vm8 = vcmask 900096   ;;  %vm265_vm9 = vcmask 908288  }
  0x2e   : > { %s1212_s15 = smov 112   ;;  %vm362_vm10 = vcmask 1031168   ;;  %vm377_vm11 = vcmask 916480   ;;  %vm534_vm12 = vcmask 1043456   ;;  %vm530_vm13 = vcmask 588800  }
  0x33   : > { %329 = vrot.lane.b32.xlu0 %v275_v4, %s1200_s23  ;;  %305 = vrot.lane.b32.xlu2 %v275_v4, %s1202_s26 }
  0x34   : > { %317 = vrot.lane.b32.xlu1 %v1353_v5, %s1201_s25  ;;  %s1152_s25 = scalar_lea.hbm %s1690_s5, 32 }
  0x3b   : > { %276 = vrot.lane.b32.xlu0 %v274_v2, %s1203_s29  ;;  %288 = vrot.lane.b32.xlu2 %v1349_v3, %s1204_s8 }
  0x3c   : > { %278 = vrot.lane.b32.xlu1 %v275_v4, %s1203_s29 }
  0x43   : > { %290 = vrot.lane.b32.xlu0 %v1353_v5, %s1204_s8  ;;  %1018 = vrot.lane.b32.xlu2 %v1017_v9, %s1206_s28 }
  0x44   : > { %1023 = vrot.lane.b32.xlu1 %v1017_v9, %s1207_s9 }
  0x4b   : > { %428 = vrot.lane.b32.xlu0 %v1205_v6, %s1206_s28 }
  0x85   : > { %v1371_v10 = vpop.permute.xlu2 %303 }
  0x86   : > { %v312_v39 = vmul.f32 %v1371_v10, %v1363_v7 }
  0x8d   : > { %v306_v11 = vpop.permute.xlu2 %305 }
  0x8e   : > { %v1373_v12 = vmul.f32 0.0, %v306_v11  ;;  %v1422_v35 = vsel %vm307_vm3, %v1371_v10, %v306_v11 }
  0x8f   : > { %v313_v40 = vmul.f32 %v1422_v35, %v1365_v8 }
  0x90   : > { %398 = vrot.lane.b32.xlu0 %v1373_v12, %s1208_s10 }
  0x91   : > { %v1037_v43 = vpack.i.bf16 %v313_v40, %v312_v39 }
  0x95   : > { %v289_v30 = vpop.permute.xlu2 %288 }
  0x96   : > { %v1413_v32 = vmul.f32 0.0, %v289_v30 }
  0x9d   : > { %v1377_v13 = vpop.permute.xlu0 %327  ;;  %v1452_v46 = vpop.permute.xlu2 %1018 }
  0x9e   : > { %v1379_v14 = vpop.permute.xlu1 %315  ;;  %v336_v25 = vmul.f32 %v1377_v13, %v1363_v7  ;;  %v1021_v63 = vunpack.i.h.bf16 %v1452_v46  ;;  %v1020_v0 = vunpack.i.l.bf16 %v1452_v46 }
  0x9f   : > { %v324_v20 = vmul.f32 %v1379_v14, %v1363_v7 }
  0xa0   : > { %v431_v9 = vsel %vm430_vm7, %v1020_v0, %v1021_v63 }
  0xa5   : > { %v330_v15 = vpop.permute.xlu0 %329 }
  0xa6   : > { %v318_v16 = vpop.permute.xlu1 %317  ;;  %v1381_v17 = vmul.f32 0.0, %v330_v15  ;;  %v1392_v21 = vsel %vm331_vm1, %v1377_v13, %v330_v15  ;;  %v1213_v15 = vmov 0  }
  0xa7   : > { %v1384_v18 = vsel %vm319_vm0, %v1379_v14, %v318_v16  ;;  %v1386_v19 = vmul.f32 0.0, %v318_v16  ;;  %v337_v24 = vmul.f32 %v1392_v21, %v1365_v8  ;;  %1057 = vset.pattern.permute.xlu0 %v1213_v15  ;;  %v1214_v16 = vmov 1  }
  0xa8   : > { %v325_v22 = vmul.f32 %v1384_v18, %v1365_v8  ;;  %443 = vrot.lane.b32.xlu2 %v1381_v17, %s1209_s12  ;;  %1058 = vset.pattern.permute.xlu1 %v1214_v16 }
  0xa9   : > { %413 = vrot.lane.b32.xlu1 %v1386_v19, %s1210_s14  ;;  %v1027_v29 = vpack.i.bf16 %v337_v24, %v336_v25 }
  0xaa   : > { %v1032_v23 = vpack.i.bf16 %v325_v22, %v324_v20 }
  0xac   : > { %1033 = vrot.lane.b32.xlu0 %v1032_v23, %s1210_s14 }
  0xad   : > { %v277_v26 = vpop.permute.xlu0 %276 }
  0xae   : > { %v1405_v27 = vpop.permute.xlu1 %278  ;;  %v1437_v41 = vmul.f32 0.0, %v277_v26 }
  0xaf   : > { %v287_v28 = vmul.f32 %v1405_v27, %v1365_v8  ;;  %v1425_v36 = vsel %vm280_vm4, %v277_v26, %v1405_v27 }
  0xb0   : > { %v286_v42 = vmul.f32 %v1425_v36, %v1363_v7 }
  0xb1   : > { %1028 = vrot.lane.b32.xlu1 %v1027_v29, %s1209_s12  ;;  %360 = vrot.lane.b32.xlu2 %v287_v28, %s1211_s13 }
  0xb2   : > { %v1042_v44 = vpack.i.bf16 %v286_v42, %v1437_v41 }
  0xb5   : > { %v1411_v31 = vpop.permute.xlu0 %290 }
  0xb6   : > { %v299_v33 = vmul.f32 %v1411_v31, %v1365_v8  ;;  %v1419_v34 = vsel %vm292_vm2, %v289_v30, %v1411_v31  ;;  %v1454_v49 = vpop.permute.xlu1 %1023 }
  0xb7   : > { %v298_v37 = vmul.f32 %v1419_v34, %v1363_v7  ;;  %v1026_v24 = vunpack.i.h.bf16 %v1454_v49  ;;  %v1025_v25 = vunpack.i.l.bf16 %v1454_v49 }
  0xb9   : > { %375 = vrot.lane.b32.xlu1 %v299_v33, %s1212_s15  ;;  %261 = vrot.lane.b32.xlu2 %v1349_v3, %s1207_s9  ;;  %v1047_v38 = vpack.i.bf16 %v298_v37, %v1413_v32  ;;  %v387_v37 = vsel %vm265_vm9, %v1025_v25, %v1026_v24 }
  0xbb   : > { %1048 = vrot.lane.b32.xlu0 %v1047_v38, %s1212_s15 }
  0xbd   : > { %v429_v48 = vpop.permute.xlu0 %428 }
  0xc1   : > { %1038 = vrot.lane.b32.xlu2 %v1037_v43, %s1208_s10  ;;  %1043 = vrot.lane.b32.xlu1 %v1042_v44, %s1211_s13 }
  0xc3   : > { %263 = vrot.lane.b32.xlu0 %v1353_v5, %s1207_s9 }
  0xc9   : > { %1053 = vrot.lane.b32.xlu1 %v1052_v45, %s1204_s8  ;;  %346 = vrot.lane.b32.xlu2 %v1365_v8, %s1204_s8  ;;  %v432_v45 = vsel %vm430_vm7, %v1021_v63, %v429_v48 }
 0x102   : > { %v444_v47 = vpop.permute.xlu2 %443  ;;  %v1458_v51 = vpop.permute.xlu0 %398 }
 0x10b   : > { %v1456_v50 = vpop.permute.xlu2 %360 }
 0x113   : > { %v1460_v53 = vpop.permute.xlu2 %261 }
 0x114   : > { %v1502_v63 = vmul.f32 0.0, %v1460_v53 }
 0x11b   : > { %v414_v52 = vpop.permute.xlu1 %413  ;;  %v1039_v4 = vpop.permute.xlu2 %1038 }
 0x11c   : > { %v1041_v20 = vunpack.i.h.bf16 %v1039_v4  ;;  %v1040_v22 = vunpack.i.l.bf16 %v1039_v4 }
 0x11e   : > { %v1034_v57 = vpop.permute.xlu0 %1033  ;;  %v401_v29 = vsel %vm400_vm8, %v1040_v22, %v1041_v20  ;;  %v457_v33 = vpack.c.bf16 %v1040_v22, %v1025_v25 }
 0x11f   : > { %v1036_v61 = vunpack.i.h.bf16 %v1034_v57  ;;  %v1035_v62 = vunpack.i.l.bf16 %v1034_v57  ;;  %v458_v42 = vpack.c.bf16 %v401_v29, %v387_v37 }
 0x121   : > { %v416_v3 = vsel %vm415_vm6, %v1035_v62, %v1036_v61  ;;  %v460_v5 = vpack.c.bf16 %v1020_v0, %v1035_v62  ;;  %v417_v44 = vsel %vm415_vm6, %v1036_v61, %v414_v52  ;;  %v402_v61 = vsel %vm400_vm8, %v1041_v20, %v1458_v51 }
 0x122   : > { %v461_v11 = vpack.c.bf16 %v431_v9, %v416_v3 }
 0x123   : > { %v1029_v54 = vpop.permute.xlu1 %1028  ;;  %v347_v48 = vpop.permute.xlu2 %346 }
 0x124   : > { %v1031_v55 = vunpack.i.h.bf16 %v1029_v54  ;;  %v1030_v56 = vunpack.i.l.bf16 %v1029_v54  ;;  %v462_v54 = vpack.c.bf16 %v432_v45, %v417_v44 }
 0x126   : > { %v463_v58 = vpack.c.bf16 %v1030_v56, %v1030_v56  ;;  %v446_v59 = vsel %vm445_vm5, %v1030_v56, %v1031_v55  ;;  %v447_v23 = vsel %vm445_vm5, %v1031_v55, %v444_v47 }
 0x127   : > { %v464_v60 = vpack.c.bf16 %v446_v59, %v446_v59  ;;  %v465_v28 = vpack.c.bf16 %v447_v23, %v447_v23 }
 0x128   : > { %505 = vrot.lane.b32.xlu0 %v463_v58, %s1200_s23 }
 0x129   : > { %507 = vrot.lane.b32.xlu1 %v464_v60, %s1200_s23 }
 0x12b   : > { %v376_v1 = vpop.permute.xlu1 %375 }
 0x12c   : > { %v456_v2 = vpack.c.bf16 %v376_v1, %v1456_v50 }
 0x12d   : > { %v1049_v30 = vpop.permute.xlu0 %1048 }
 0x12e   : > { %491 = vrot.lane.b32.xlu2 %v456_v2, %s1200_s23  ;;  %v1050_v38 = vunpack.i.l.bf16 %v1049_v30  ;;  %v1051_v43 = vunpack.i.h.bf16 %v1049_v30 }
 0x130   : > { %499 = vrot.lane.b32.xlu0 %v460_v5, %s1200_s23  ;;  %v378_v47 = vsel %vm377_vm11, %v1050_v38, %v1051_v43  ;;  %v379_v57 = vsel %vm377_vm11, %v1051_v43, %v376_v1  ;;  %v459_v1 = vpack.c.bf16 %v402_v61, %v1026_v24  ;;  %v1516_v5 = vld [vmem:[%s1688_s3] sm:$0xff] }
 0x131   : > { %501 = vrot.lane.b32.xlu1 %v461_v11, %s1200_s23 }
 0x133   : > { %v1044_v26 = vpop.permute.xlu1 %1043 }
 0x134   : > { %v1046_v39 = vunpack.i.h.bf16 %v1044_v26  ;;  %v1045_v40 = vunpack.i.l.bf16 %v1044_v26 }
 0x135   : > { %v1489_v58 = vpop.permute.xlu0 %263 }
 0x136   : > { %509 = vrot.lane.b32.xlu2 %v465_v28, %s1200_s23  ;;  %v363_v46 = vsel %vm362_vm10, %v1045_v40, %v1046_v39  ;;  %v364_v55 = vsel %vm362_vm10, %v1046_v39, %v1456_v50  ;;  %v1498_v50 = vsel %vm265_vm9, %v1460_v53, %v1489_v58  ;;  %v272_v4 = vmul.f32 %v1489_v58, %v1365_v8 }
 0x137   : > { %v454_v56 = vpack.c.bf16 %v378_v47, %v363_v46  ;;  %v455_v60 = vpack.c.bf16 %v379_v57, %v364_v55  ;;  %v271_v2 = vmul.f32 %v1498_v50, %v1363_v7 }
 0x138   : > { %493 = vrot.lane.b32.xlu0 %v457_v33, %s1200_s23  ;;  %v453_v53 = vpack.c.bf16 %v347_v48, %v272_v4 }
 0x139   : > { %495 = vrot.lane.b32.xlu1 %v458_v42, %s1200_s23 }
 0x13b   : > { %v1054_v49 = vpop.permute.xlu1 %1053 }
 0x13c   : > { %v1056_v52 = vunpack.i.h.bf16 %v1054_v49  ;;  %v1055_v59 = vunpack.i.l.bf16 %v1054_v49  ;;  %v252_v49 = vld [vmem:[%s1686_s1] sm:$0xf] }
 0x13e   : > { %503 = vrot.lane.b32.xlu2 %v462_v54, %s1200_s23  ;;  %v348_v62 = vsel %vm292_vm2, %v1055_v59, %v1056_v52  ;;  %v349_v0 = vsel %vm292_vm2, %v1056_v52, %v347_v48 }
 0x13f   : > { %v451_v51 = vpack.c.bf16 %v348_v62, %v1502_v63  ;;  %v452_v3 = vpack.c.bf16 %v349_v0, %v271_v2 }
 0x140   : > { %487 = vrot.lane.b32.xlu0 %v454_v56, %s1200_s23 }
 0x141   : > { %489 = vrot.lane.b32.xlu1 %v455_v60, %s1200_s23 }
 0x146   : > { %497 = vrot.lane.b32.xlu2 %v459_v1, %s1200_s23 }
 0x148   : > { %481 = vrot.lane.b32.xlu0 %v451_v51, %s1200_s23 }
 0x149   : > { %483 = vrot.lane.b32.xlu1 %v452_v3, %s1200_s23 }
 0x14e   : > { %485 = vrot.lane.b32.xlu2 %v453_v53, %s1200_s23 }
 0x150   : > { %569 = vperm.xlu0 %1057, %v1516_v5  }
 0x151   : > { %575 = vperm.xlu1 %1058, %v1516_v5  }
 0x156   : > { %694 = vrot.lane.b32.xlu2 %v1205_v6, %s1206_s28 }
 0x158   : > { %680 = vrot.lane.b32.xlu0 %v1386_v19, %s1210_s14 }
 0x159   : > { %708 = vrot.lane.b32.xlu1 %v1381_v17, %s1209_s12 }
 0x15e   : > { %666 = vrot.lane.b32.xlu2 %v1373_v12, %s1208_s10 }
 0x188   : > { %v492_v9 = vpop.permute.xlu2 %491 }
 0x190   : > { %v510_v11 = vpop.permute.xlu2 %509 }
 0x198   : > { %v504_v19 = vpop.permute.xlu2 %503 }
 0x19a   : > { %v506_v15 = vpop.permute.xlu0 %505 }
 0x19b   : > { %v508_v16 = vpop.permute.xlu1 %507 }
 0x19c   : > { %v520_v20 = vsel %vm331_vm1, %v506_v15, %v508_v16  ;;  %v521_v22 = vsel %vm331_vm1, %v508_v16, %v510_v11 }
 0x19d   : > { %v536_v23 = vsel %vm534_vm12, %v520_v20, 0  ;;  %v539_v24 = vsel %vm534_vm12, %v521_v22, 0 }
 0x19e   : > { %544 = vmatpush.bf16.msra.mxu0 %v536_v23  ;;  %557 = vmatpush.bf16.msra.mxu1 %v539_v24 }
 0x1a0   : > { %v498_v29 = vpop.permute.xlu2 %497 }
 0x1a2   : > { %v500_v17 = vpop.permute.xlu0 %499 }
 0x1a3   : > { %v502_v25 = vpop.permute.xlu1 %501 }
 0x1a4   : > { %v518_v12 = vsel %vm331_vm1, %v500_v17, %v502_v25  ;;  %v519_v26 = vsel %vm331_vm1, %v502_v25, %v504_v19 }
 0x1a5   : > { %545 = vmatpush.bf16.msra.mxu0 %v518_v12  ;;  %558 = vmatpush.bf16.msra.mxu1 %v519_v26 }
 0x1a8   : > { %v486_v44 = vpop.permute.xlu2 %485 }
 0x1aa   : > { %v494_v28 = vpop.permute.xlu0 %493 }
 0x1ab   : > { %v496_v30 = vpop.permute.xlu1 %495 }
 0x1ac   : > { %v516_v33 = vsel %vm331_vm1, %v494_v28, %v496_v30  ;;  %v517_v37 = vsel %vm331_vm1, %v496_v30, %v498_v29 }
 0x1ad   : > { %546 = vmatpush.bf16.msra.mxu0 %v516_v33  ;;  %559 = vmatpush.bf16.msra.mxu1 %v517_v37 }
 0x1b2   : > { %v488_v38 = vpop.permute.xlu0 %487 }
 0x1b3   : > { %v490_v39 = vpop.permute.xlu1 %489 }
 0x1b4   : > { %v514_v40 = vsel %vm331_vm1, %v488_v38, %v490_v39  ;;  %v515_v42 = vsel %vm331_vm1, %v490_v39, %v492_v9 }
 0x1b5   : > { %547 = vmatpush.bf16.msra.mxu0 %v514_v40  ;;  %560 = vmatpush.bf16.msra.mxu1 %v515_v42 }
 0x1ba   : > { %v482_v43 = vpop.permute.xlu0 %481 }
 0x1bb   : > { %v484_v45 = vpop.permute.xlu1 %483 }
 0x1bc   : > { %v512_v46 = vsel %vm331_vm1, %v482_v43, %v484_v45  ;;  %v513_v47 = vsel %vm331_vm1, %v484_v45, %v486_v44 }
 0x1bd   : > { %548 = vmatpush.bf16.msra.mxu0 %v512_v46  ;;  %561 = vmatpush.bf16.msra.mxu1 %v513_v47 }
 0x1c0   : > { %943 = vmatmul.msk.bf16.vlgmr.msra.gmra.mxu0 %vm530_vm13, %v252_v49  ;;  %944 = vmatmul.msk.bf16.vlgmr.msra.gmra.mxu1 %vm530_vm13, %v252_v49 }
 0x1c2   : > { %v570_v54 = vpop.permute.xlu0 %569 }
 0x1c3   : > { %v576_v59 = vpop.permute.xlu1 %575 }
 0x1cb   : > { %v709_v19 = vpop.permute.xlu1 %708 }
 0x23d   : > { %v550_v55 = vpop.f32.mrf.mxu0  ;;  %v563_v56 = vpop.f32.mrf.mxu1 }
 0x23e   : > { %v572_v57 = vmul.f32 %v570_v54, %v550_v55  ;;  %v573_v52 = vmul.f32 %v570_v54, %v563_v56 }
 0x240   : > { %v578_v60 = vadd.f32 %v576_v59, %v572_v57  ;;  %v579_v48 = vadd.f32 %v576_v59, %v573_v52 }
 0x242   : > { %v1546_v61 = vmax.f32 %v578_v60, 0.0  ;;  %v1548_v62 = vmax.f32 %v579_v48, 0.0 }
 0x244   : > { %v1064_v0 = vpack.i.bf16 %v1548_v62, %v1546_v61  ;;  %v606_v1 = vmul.f32 %v1546_v61, %v1377_v13  ;;  %v607_v2 = vmul.f32 %v1548_v62, %v1392_v21  ;;  %v600_v53 = vmul.f32 %v1546_v61, %v1371_v10 }
 0x245   : > { %v552_v51 = vpop.f32.mrf.mxu0  ;;  %v565_v3 = vpop.f32.mrf.mxu1  ;;  %v601_v9 = vmul.f32 %v1548_v62, %v1422_v35  ;;  %v592_v13 = vmul.f32 %v1546_v61, %v1425_v36  ;;  %v603_v21 = vmul.f32 %v1546_v61, %v1379_v14  ;;  %v604_v11 = vmul.f32 %v1548_v62, %v1384_v18 }
 0x246   : > { %1065 = vrot.lane.b32.xlu0 %v1064_v0, %s1207_s9  ;;  %1060 = vrot.lane.b32.xlu1 %v1064_v0, %s1206_s28  ;;  %v1069_v4 = vpack.i.bf16 %v607_v2, %v606_v1  ;;  %v595_v35 = vmul.f32 %v1546_v61, %v1419_v34  ;;  %v593_v36 = vmul.f32 %v1548_v62, %v1405_v27  ;;  %v1588_v27 = vpop.permute.xlu2 %694 }
 0x247   : > { %v1079_v15 = vpack.i.bf16 %v601_v9, %v600_v53  ;;  %v1084_v16 = vpack.i.bf16 %v592_v13, %v1437_v41  ;;  %v1074_v10 = vpack.i.bf16 %v604_v11, %v603_v21  ;;  %v596_v14 = vmul.f32 %v1548_v62, %v1411_v31 }
 0x248   : > { %1070 = vrot.lane.b32.xlu2 %v1069_v4, %s1209_s12  ;;  %v1089_v18 = vpack.i.bf16 %v595_v35, %v1413_v32  ;;  %v1094_v41 = vpack.i.bf16 %v1546_v61, %v1205_v6  ;;  %v681_v6 = vpop.permute.xlu0 %680  ;;  %v589_v35 = vmul.f32 %v1546_v61, %v1498_v50  ;;  %s242_s12 = scalar_lea.vmem [#allocation6], %s940_s11 }
 0x24e   : > { %1080 = vrot.lane.b32.xlu1 %v1079_v15, %s1208_s10  ;;  %1085 = vrot.lane.b32.xlu0 %v1084_v16, %s1211_s13  ;;  %v1590_v34 = vpop.permute.xlu2 %666 }
 0x250   : > { %1075 = vrot.lane.b32.xlu2 %v1074_v10, %s1210_s14  ;;  %s860_s14 = sshll.u32 %s242_s12, 4  ;;  %s861_s14 = int_to_ptr.vmem [resolvable:$true] %s860_s14 }
 0x256   : > { %630 = vrot.lane.b32.xlu1 %v593_v36, %s1211_s13  ;;  %644 = vrot.lane.b32.xlu0 %v596_v14, %s1212_s15  ;;  %s847_s13 = scalar_lea.sflag [#allocation5], %s1333_s7 }
 0x258   : > { %1090 = vrot.lane.b32.xlu2 %v1089_v18, %s1212_s15 }
 0x25e   : > { %1095 = vrot.lane.b32.xlu1 %v1094_v41, %s1204_s8 }
 0x260   : > { %616 = vrot.lane.b32.xlu2 %v1548_v62, %s1204_s8  ;;  %s953_s8 = sshll.u32 %s1268_s22, 4 }
 0x261   : > { %s858_s10 = scalar_lea.hbm %s1690_s5, %s953_s8 }
 0x262   : > { %s862_s22 = sshll.u32 %s858_s10, 4  ;;  %s863_s22 = int_to_ptr.hbm [resolvable:$true] %s862_s22 }
 0x263   : > { %s1146_s15 = sshra.s32 %s863_s22, 4  ;;  %s1147_s15 = int_to_ptr.hbm [resolvable:$true] %s1146_s15 }
 0x264   : > { %s1148_s16 = scalar_lea.hbm %s1147_s15, 16  ;;  %p1153_p0 = scmp.lt.s32.totalorder %s1147_s15, %s1690_s5 }
 0x265   : > { %p1149_p6 = scmp.ne.s32.totalorder %s1147_s15, %s1148_s16  ;;  %p1154_p1 = scmp.lt.s32.totalorder %s1152_s25, %s1148_s16 }
 0x267   : > { %p1150_p9 = pnand %p1149_p6, %p1297_p11  ;;  %p1155_p3 = por %p1154_p1, %p1153_p0 }
 0x269   : > { %p1151_p13 = pneg %p1150_p9 }
 0x26b   : > { %p1156_p4 = pnand %p1155_p3, %p1151_p13 }
 0x2a2   : > { %v1071_v31 = vpop.permute.xlu2 %1070 }
 0x2a3   : > { %v1073_v20 = vunpack.i.h.bf16 %v1071_v31  ;;  %v1072_v22 = vunpack.i.l.bf16 %v1071_v31 }
 0x2a5   : > { %v727_v23 = vpack.c.bf16 %v1072_v22, %v1072_v22  ;;  %v710_v32 = vsel %vm445_vm5, %v1072_v22, %v1073_v20  ;;  %v711_v13 = vsel %vm445_vm5, %v1073_v20, %v709_v19 }
 0x2a6   : > { %v728_v24 = vpack.c.bf16 %v710_v32, %v710_v32  ;;  %v729_v16 = vpack.c.bf16 %v711_v13, %v711_v13 }
 0x2a7   : > { %769 = vrot.lane.b32.xlu0 %v727_v23, %s1200_s23 }
 0x2a8   : > { %771 = vrot.lane.b32.xlu1 %v728_v24, %s1200_s23 }
 0x2aa   : > { %v1076_v17 = vpop.permute.xlu2 %1075 }
 0x2ab   : > { %v1078_v25 = vunpack.i.h.bf16 %v1076_v17  ;;  %v1077_v12 = vunpack.i.l.bf16 %v1076_v17 }
 0x2ad   : > { %v682_v37 = vsel %vm415_vm6, %v1077_v12, %v1078_v25  ;;  %v683_v20 = vsel %vm415_vm6, %v1078_v25, %v681_v6  ;;  %v1215_v25 = vmov 2  }
 0x2ae   : > { %1099 = vset.pattern.permute.xlu0 %v1215_v25 }
 0x2b2   : > { %v1091_v47 = vpop.permute.xlu2 %1090 }
 0x2b3   : > { %v1093_v59 = vunpack.i.h.bf16 %v1091_v47  ;;  %v1092_v60 = vunpack.i.l.bf16 %v1091_v47 }
 0x2b5   : > { %v646_v4 = vsel %vm377_vm11, %v1092_v60, %v1093_v59 }
 0x2b8   : > { %v1066_v26 = vpop.permute.xlu0 %1065  ;;  %v1061_v28 = vpop.permute.xlu1 %1060 }
 0x2b9   : > { %v1063_v29 = vunpack.i.h.bf16 %v1061_v28  ;;  %v1062_v30 = vunpack.i.l.bf16 %v1061_v28  ;;  %v1068_v40 = vunpack.i.h.bf16 %v1066_v26  ;;  %v1067_v42 = vunpack.i.l.bf16 %v1066_v26 }
 0x2ba   : > { %v617_v10 = vpop.permute.xlu2 %616 }
 0x2bb   : > { %v724_v33 = vpack.c.bf16 %v1062_v30, %v1077_v12  ;;  %v696_v38 = vsel %vm430_vm7, %v1062_v30, %v1063_v29  ;;  %v655_v54 = vsel %vm265_vm9, %v1067_v42, %v1068_v40  ;;  %v697_v31 = vsel %vm430_vm7, %v1063_v29, %v1588_v27 }
 0x2bc   : > { %v725_v39 = vpack.c.bf16 %v696_v38, %v682_v37  ;;  %v726_v22 = vpack.c.bf16 %v697_v31, %v683_v20  ;;  %v1216_v12 = vmov 3  }
 0x2bd   : > { %763 = vrot.lane.b32.xlu0 %v724_v33, %s1200_s23  ;;  %1100 = vset.pattern.permute.xlu1 %v1216_v12 }
 0x2be   : > { %765 = vrot.lane.b32.xlu1 %v725_v39, %s1200_s23 }
 0x2c0   : > { %v1086_v43 = vpop.permute.xlu0 %1085  ;;  %v1081_v44 = vpop.permute.xlu1 %1080 }
 0x2c1   : > { %v1083_v45 = vunpack.i.h.bf16 %v1081_v44  ;;  %v1082_v46 = vunpack.i.l.bf16 %v1081_v44  ;;  %v1088_v56 = vunpack.i.h.bf16 %v1086_v43  ;;  %v1087_v57 = vunpack.i.l.bf16 %v1086_v43 }
 0x2c3   : > { %v721_v49 = vpack.c.bf16 %v1082_v46, %v1067_v42  ;;  %v668_v55 = vsel %vm400_vm8, %v1082_v46, %v1083_v45  ;;  %v632_v1 = vsel %vm362_vm10, %v1087_v57, %v1088_v56  ;;  %v669_v50 = vsel %vm400_vm8, %v1083_v45, %v1590_v34 }
 0x2c4   : > { %v722_v52 = vpack.c.bf16 %v668_v55, %v655_v54  ;;  %v718_v53 = vpack.c.bf16 %v646_v4, %v632_v1  ;;  %v723_v61 = vpack.c.bf16 %v669_v50, %v1068_v40  ;;  %v582_v55 = vld [vmem:[%s1687_s2] sm:$0xf] }
 0x2c5   : > { %757 = vrot.lane.b32.xlu0 %v721_v49, %s1200_s23 }
 0x2c6   : > { %759 = vrot.lane.b32.xlu1 %v722_v52, %s1200_s23 }
 0x2c8   : > { %v645_v48 = vpop.permute.xlu0 %644  ;;  %v631_v0 = vpop.permute.xlu1 %630 }
 0x2c9   : > { %v647_v2 = vsel %vm377_vm11, %v1093_v59, %v645_v48  ;;  %v633_v51 = vsel %vm362_vm10, %v1088_v56, %v631_v0  ;;  %v720_v3 = vpack.c.bf16 %v645_v48, %v631_v0 }
 0x2ca   : > { %v719_v9 = vpack.c.bf16 %v647_v2, %v633_v51 }
 0x2cb   : > { %755 = vrot.lane.b32.xlu2 %v720_v3, %s1200_s23 }
 0x2cd   : > { %751 = vrot.lane.b32.xlu0 %v718_v53, %s1200_s23 }
 0x2ce   : > { %753 = vrot.lane.b32.xlu1 %v719_v9, %s1200_s23 }
 0x2d0   : > { %v1096_v21 = vpop.permute.xlu1 %1095 }
 0x2d1   : > { %v1098_v11 = vunpack.i.h.bf16 %v1096_v21  ;;  %v1097_v15 = vunpack.i.l.bf16 %v1096_v21 }
 0x2d3   : > { %773 = vrot.lane.b32.xlu2 %v729_v16, %s1200_s23  ;;  %v618_v36 = vsel %vm292_vm2, %v1097_v15, %v1098_v11  ;;  %v619_v14 = vsel %vm292_vm2, %v1098_v11, %v617_v10 }
 0x2d4   : > { %v715_v18 = vpack.c.bf16 %v618_v36, %v1502_v63  ;;  %v716_v41 = vpack.c.bf16 %v619_v14, %v589_v35  ;;  %v590_v63 = vmul.f32 %v1548_v62, %v1489_v58 }
 0x2d6   : > { %745 = vrot.lane.b32.xlu0 %v715_v18, %s1200_s23  ;;  %747 = vrot.lane.b32.xlu1 %v716_v41, %s1200_s23  ;;  %v717_v23 = vpack.c.bf16 %v617_v10, %v590_v63 }
 0x2db   : > { %767 = vrot.lane.b32.xlu2 %v726_v22, %s1200_s23 }
 0x2de   : > { %829 = vperm.xlu0 %1099, %v1516_v5   ;;  %835 = vperm.xlu1 %1100, %v1516_v5  }
 0x2e3   : > { %761 = vrot.lane.b32.xlu2 %v723_v61, %s1200_s23 }
 0x2e6   : > { %1101 = vset.pattern.permute.xlu0 %v1216_v12 }
 0x2eb   : > { %749 = vrot.lane.b32.xlu2 %v717_v23, %s1200_s23 }
 0x319   : > { %v770_v32 = vpop.permute.xlu0 %769 }
 0x31a   : > { %v772_v24 = vpop.permute.xlu1 %771 }
 0x31b   : > { %v783_v27 = vsel %vm331_vm1, %v770_v32, %v772_v24 }
 0x31c   : > { %v797_v6 = vsel %vm534_vm12, %v783_v27, 0 }
 0x31d   : > { %805 = vmatpush.bf16.msra.mxu2 %v797_v6 }
 0x325   : > { %v756_v19 = vpop.permute.xlu2 %755 }
 0x32d   : > { %v774_v17 = vpop.permute.xlu2 %773 }
 0x32e   : > { %v784_v34 = vsel %vm331_vm1, %v772_v24, %v774_v17 }
 0x32f   : > { %v764_v26 = vpop.permute.xlu0 %763  ;;  %v800_v58 = vsel %vm534_vm12, %v784_v34, 0 }
 0x330   : > { %818 = vmatpush.bf16.msra.mxu3 %v800_v58  ;;  %v766_v62 = vpop.permute.xlu1 %765 }
 0x331   : > { %v781_v28 = vsel %vm331_vm1, %v764_v26, %v766_v62 }
 0x332   : > { %806 = vmatpush.bf16.msra.mxu2 %v781_v28 }
 0x335   : > { %v768_v29 = vpop.permute.xlu2 %767 }
 0x336   : > { %v782_v30 = vsel %vm331_vm1, %v766_v62, %v768_v29 }
 0x337   : > { %v758_v33 = vpop.permute.xlu0 %757  ;;  %819 = vmatpush.bf16.msra.mxu3 %v782_v30 }
 0x338   : > { %v760_v37 = vpop.permute.xlu1 %759 }
 0x339   : > { %v779_v38 = vsel %vm331_vm1, %v758_v33, %v760_v37 }
 0x33a   : > { %807 = vmatpush.bf16.msra.mxu2 %v779_v38 }
 0x33d   : > { %v762_v39 = vpop.permute.xlu2 %761 }
 0x33e   : > { %v780_v40 = vsel %vm331_vm1, %v760_v37, %v762_v39 }
 0x33f   : > { %v752_v42 = vpop.permute.xlu0 %751  ;;  %820 = vmatpush.bf16.msra.mxu3 %v780_v40 }
 0x340   : > { %v754_v5 = vpop.permute.xlu1 %753 }
 0x341   : > { %v777_v43 = vsel %vm331_vm1, %v752_v42, %v754_v5  ;;  %v778_v44 = vsel %vm331_vm1, %v754_v5, %v756_v19 }
 0x342   : > { %808 = vmatpush.bf16.msra.mxu2 %v777_v43 }
 0x343   : > { %821 = vmatpush.bf16.msra.mxu3 %v778_v44 }
 0x345   : > { %v750_v45 = vpop.permute.xlu2 %749 }
 0x348   : > { %v746_v46 = vpop.permute.xlu0 %745  ;;  %v748_v47 = vpop.permute.xlu1 %747 }
 0x349   : > { %v775_v49 = vsel %vm331_vm1, %v746_v46, %v748_v47  ;;  %v776_v54 = vsel %vm331_vm1, %v748_v47, %v750_v45 }
 0x34a   : > { %809 = vmatpush.bf16.msra.mxu2 %v775_v49  ;;  %822 = vmatpush.bf16.msra.mxu3 %v776_v54 }
 0x34d   : > { %945 = vmatmul.msk.bf16.vlgmr.msra.gmra.mxu2 %vm530_vm13, %v582_v55  ;;  %946 = vmatmul.msk.bf16.vlgmr.msra.gmra.mxu3 %vm530_vm13, %v582_v55 }
 0x350   : > { %v830_v56 = vpop.permute.xlu0 %829  ;;  %v836_v57 = vpop.permute.xlu1 %835 }
 0x3d0   : > { %v811_v52 = vpop.f32.mrf.mxu2  ;;  %v824_v59 = vpop.f32.mrf.mxu3 }
 0x3d1   : > { %v832_v60 = vmul.f32 %v830_v56, %v811_v52  ;;  %v833_v48 = vmul.f32 %v830_v56, %v824_v59 }
 0x3d3   : > { %v838_v0 = vadd.f32 %v836_v57, %v832_v60  ;;  %v839_v1 = vadd.f32 %v836_v57, %v833_v48 }
 0x3d5   : > { %v840_v2 = vadd.f32 %v838_v0, %v1363_v7  ;;  %v841_v51 = vadd.f32 %v839_v1, %v1365_v8 }
 0x3d7   : > { %v842_v3 = vmax.f32 %v840_v2, 0.0  ;;  %v843_v4 = vmax.f32 %v841_v51, 0.0 }
 0x3d8   : > { %v813_v53 = vpop.f32.mrf.mxu2  ;;  %v826_v9 = vpop.f32.mrf.mxu3 }
 0x3d9   : > { %844 = vst [vmem:[%s242_s12] sm:$0xff] %v842_v3 }
 0x3da   : > { %845 = vst [vmem:[%s242_s12 + $0x8] sm:$0xff] %v843_v4 }
 0x3db   : > { %1159 = shalt.err (!%p1156_p4)
}
 0x3dc   : > { %956 = dma.vmem_to_hbm [thread:$0]  (%p1297_p11), %s861_s14, 256, %s863_s22, %s847_s13  }
 0x3dd PF: > { %s874_s7 = sand.u32 1, %s1186_s18   ;;  %p1696_p7 = scmp.ge.s32.totalorder %s1198_s21, 2 }
 0x3de   : > { %s875_s29 = scalar_lea.sflag [#allocation5], %s874_s7 }
 0x3df   : > { %p963_p5 = pnand %p1696_p7, %p1301_p12 }
 0x3e1   : > { %p964_p8 = pneg %p963_p5 }
 0x3e3   : > { %1181 = dma.done.wait (%p964_p8), %s875_s29, 256  }
 0x3e4   : > { %1183 = vsyncadd (%p964_p8), %s875_s29, 4294967040  ;;  %p18_p10 = scmp.ge.s32.totalorder %s1272_s24, 4   ;;  %s1697_s18 = smov %s1190_s19 }
 0x3e5   : > { %s1698_s19 = smov %s1194_s20  ;;  %s1699_s20 = smov %s1284_s27 }
 0x3e6   : > { %s1700_s21 = smov %s1272_s24  ;;  %20 = sbr.rel (!%p18_p10) target bundleno = 5 (0x5), region = 86 }
 0x3eb   :  { %881 = vsyncpa [#allocation4], 1 }
 0x3ec   :  { %883 = vsyncpa [#allocation4 + $0x1], 1 }
 0x3ed   :  { %884 = vsyncpa [#allocation5], 1 }
 0x3ee   :  { %886 = vsyncpa [#allocation5 + $0x1], 1 }

</bundles_post_ra>
